<compile_context>
chip_gen: v5e
topology: v5e:2x2
jax: 0.10.0
libtpu: 0.0.40
codegen_flags: <defaults>
</compile_context>

<pallas_src>
import functools

import jax
import jax.numpy as jnp
from jax import lax
from jax.experimental import pallas as pl
from jax.experimental.pallas import tpu as pltpu


def _round_up(x, m):
    return ((x + m - 1) // m) * m


def _ws_linear_kernel(x_ref, w_ref, b_ref, o_ref, acc_ref, *, scale):
    k = pl.program_id(2)

    @pl.when(k == 0)
    def _():
        acc_ref[...] = jnp.zeros_like(acc_ref)

    # x_ref: (tm, tk), w_ref: (tn, tk).  Contract on K (axis 1 of both)
    # => (tm, tn) == x @ W.T for this tile, accumulated in f32 on the MXU.
    acc_ref[...] += lax.dot_general(
        x_ref[...],
        w_ref[...],
        dimension_numbers=(((1,), (1,)), ((), ())),
        preferred_element_type=jnp.float32,
    )

    @pl.when(k == pl.num_programs(2) - 1)
    def _():
        # Equalized-LR scale + bias epilogue, done once per output tile in f32.
        o_ref[...] = (acc_ref[...] * scale + b_ref[...]).astype(o_ref.dtype)


def weighted_scale_linear(x, weight, bias, *, tm=None, tn=None, tk=None):
    """x: (B, in_features); weight: (out_features, in_features); bias: (out_features,)."""
    M, K = x.shape
    N, Kw = weight.shape
    assert K == Kw, "weight in_features mismatch"
    scale = (2.0 / K) ** 0.5

    # Tile sizes: lane/sublane aligned, sized conservatively for v7x's smaller
    # VMEM (per-buffer << 1 MiB even at the 256/256/512 caps).
    if tm is None:
        tm = min(256, _round_up(M, 8))
    if tn is None:
        tn = min(256, _round_up(N, 128))
    if tk is None:
        tk = min(512, _round_up(K, 128))

    Mp, Np, Kp = _round_up(M, tm), _round_up(N, tn), _round_up(K, tk)

    # Zero-padding: extra K columns contribute 0 to the dot product; extra
    # M rows / N columns are sliced off below.
    xp = x if (Mp == M and Kp == K) else jnp.pad(x, ((0, Mp - M), (0, Kp - K)))
    wp = weight if (Np == N and Kp == K) else jnp.pad(weight, ((0, Np - N), (0, Kp - K)))
    bp = bias if Np == N else jnp.pad(bias, (0, Np - N))
    bp = bp.reshape(1, Np)

    grid = (Mp // tm, Np // tn, Kp // tk)

    itemsize = jnp.dtype(x.dtype).itemsize
    cost = pl.CostEstimate(
        flops=2 * M * K * N,
        transcendentals=0,
        bytes_accessed=(Mp * Kp + Np * Kp + Np + Mp * Np) * itemsize,
    )

    out = pl.pallas_call(
        functools.partial(_ws_linear_kernel, scale=scale),
        out_shape=jax.ShapeDtypeStruct((Mp, Np), x.dtype),
        grid_spec=pltpu.PrefetchScalarGridSpec(
            num_scalar_prefetch=0,
            grid=grid,
            in_specs=[
                pl.BlockSpec((tm, tk), lambda i, j, k: (i, k)),   # x tile
                pl.BlockSpec((tn, tk), lambda i, j, k: (j, k)),   # W tile (out, in)
                pl.BlockSpec((1, tn), lambda i, j, k: (0, j)),    # bias tile
            ],
            out_specs=pl.BlockSpec((tm, tn), lambda i, j, k: (i, j)),
            scratch_shapes=[pltpu.VMEM((tm, tn), jnp.float32)],
        ),
        compiler_params=pltpu.CompilerParams(
            dimension_semantics=("parallel", "parallel", "arbitrary"),
            vmem_limit_bytes=32 * 1024 * 1024,
        ),
        cost_estimate=cost,
    )(xp, wp, bp)

    if Mp != M or Np != N:
        out = out[:M, :N]
    return out


def _reference(x, weight, bias):
    scale = (2.0 / x.shape[1]) ** 0.5
    return (
        jnp.dot(x * scale, weight.T, precision=lax.Precision.HIGHEST) + bias
    )


if __name__ == "__main__":
    key = jax.random.PRNGKey(0)

    # --- Test 1: original toy shape (exercises padding to lane-dense tiles) ---
    k1, k2 = jax.random.split(key)
    B, fin, fout = 8, 32, 64
    # nn.init.normal_(weight), nn.init.zeros_(bias)
    w1 = jax.random.normal(k2, (fout, fin), dtype=jnp.float32)
    b1 = jnp.zeros((fout,), dtype=jnp.float32)
    x1 = jax.random.normal(k1, (B, fin), dtype=jnp.float32)

    o1 = jax.block_until_ready(weighted_scale_linear(x1, w1, b1))
    r1 = _reference(x1, w1, b1)
    assert o1.shape == (B, fout)
    assert jnp.allclose(o1, r1, atol=1e-4, rtol=1e-4), "mismatch vs reference (test 1)"

    # --- Test 2: larger shape exercising multi-tile N and multi-step K grid ---
    k3, k4 = jax.random.split(k2)
    B2, fin2, fout2 = 256, 1024, 384
    w2 = jax.random.normal(k4, (fout2, fin2), dtype=jnp.float32)
    b2 = jax.random.normal(k3, (fout2,), dtype=jnp.float32) * 0.1
    x2 = jax.random.normal(k1, (B2, fin2), dtype=jnp.float32)

    o2 = jax.block_until_ready(weighted_scale_linear(x2, w2, b2))
    r2 = _reference(x2, w2, b2)
    assert o2.shape == (B2, fout2)
    assert jnp.allclose(o2, r2, atol=1e-4, rtol=1e-4), "mismatch vs reference (test 2)"

    print("KERNEL_OK")
</pallas_src>

<mosaic_0001>
module attributes {stable_mosaic.version = 11 : i64} {
  func.func @_ws_linear_kernel(%arg0: i32, %arg1: i32, %arg2: i32, %arg3: memref<8x128xf32, #tpu.memory_space<vmem>>, %arg4: memref<128x128xf32, #tpu.memory_space<vmem>>, %arg5: memref<1x128xf32, #tpu.memory_space<vmem>>, %arg6: memref<8x128xf32, #tpu.memory_space<vmem>>, %arg7: memref<8x128xf32, #tpu.memory_space<vmem>>) attributes {dimension_semantics = [#tpu.dimension_semantics<parallel>, #tpu.dimension_semantics<parallel>, #tpu.dimension_semantics<arbitrary>], iteration_bounds = array<i64: 1, 1, 1>, scalar_prefetch = 0 : i64, scratch_operands = 1 : i64, tpu.core_type = #tpu.core_type<tc>, window_params = [{transform_indices = @transform_0, window_bounds = array<i64: 8, 128>}, {transform_indices = @transform_1, window_bounds = array<i64: 128, 128>}, {transform_indices = @transform_2, window_bounds = array<i64: 1, 128>}, {transform_indices = @transform_3, window_bounds = array<i64: 8, 128>}]} {
    %c0_i32 = arith.constant 0 : i32
    %0 = arith.cmpi eq, %arg2, %c0_i32 : i32
    %1 = arith.extui %0 : i1 to i32
    %c0_i32_0 = arith.constant 0 : i32
    %2 = arith.cmpi ne, %1, %c0_i32_0 : i32
    scf.if %2 {
      %cst_10 = arith.constant 0.000000e+00 : f32
      %12 = vector.broadcast %cst_10 : f32 to vector<8x128xf32>
      %c0_11 = arith.constant 0 : index
      %c0_12 = arith.constant 0 : index
      %13 = vector.load %arg7[%c0_11, %c0_12] : memref<8x128xf32, #tpu.memory_space<vmem>>, vector<8x128xf32>
      tpu.vector_store %arg7[%c0_11, %c0_12], %12 {strides = array<i32>} : memref<8x128xf32, #tpu.memory_space<vmem>>, vector<8x128xf32>,
    } else {
    }
    %c0 = arith.constant 0 : index
    %c0_1 = arith.constant 0 : index
    %3 = vector.load %arg7[%c0, %c0_1] : memref<8x128xf32, #tpu.memory_space<vmem>>, vector<8x128xf32>
    %c0_2 = arith.constant 0 : index
    %c0_3 = arith.constant 0 : index
    %4 = vector.load %arg3[%c0_2, %c0_3] : memref<8x128xf32, #tpu.memory_space<vmem>>, vector<8x128xf32>
    %c0_4 = arith.constant 0 : index
    %c0_5 = arith.constant 0 : index
    %5 = vector.load %arg4[%c0_4, %c0_5] : memref<128x128xf32, #tpu.memory_space<vmem>>, vector<128x128xf32>
    %cst = arith.constant dense<0.000000e+00> : vector<8x128xf32>
    %6 = tpu.matmul %4, %5, %cst {dimension_numbers = #tpu.dot_dimension_numbers<[1], [1], [0], [0], [0, 0, 1, 0], [], []>} : vector<8x128xf32>, vector<128x128xf32>, vector<8x128xf32> -> vector<8x128xf32>
    %7 = arith.addf %3, %6 : vector<8x128xf32>
    %c0_6 = arith.constant 0 : index
    %c0_7 = arith.constant 0 : index
    %8 = vector.load %arg7[%c0_6, %c0_7] : memref<8x128xf32, #tpu.memory_space<vmem>>, vector<8x128xf32>
    tpu.vector_store %arg7[%c0_6, %c0_7], %7 {strides = array<i32>} : memref<8x128xf32, #tpu.memory_space<vmem>>, vector<8x128xf32>,
    %c0_i32_8 = arith.constant 0 : i32
    %9 = arith.cmpi eq, %arg2, %c0_i32_8 : i32
    %10 = arith.extui %9 : i1 to i32
    %c0_i32_9 = arith.constant 0 : i32
    %11 = arith.cmpi ne, %10, %c0_i32_9 : i32
    scf.if %11 {
      %c0_10 = arith.constant 0 : index
      %c0_11 = arith.constant 0 : index
      %12 = vector.load %arg7[%c0_10, %c0_11] : memref<8x128xf32, #tpu.memory_space<vmem>>, vector<8x128xf32>
      %cst_12 = arith.constant 2.500000e-01 : f32
      %13 = vector.broadcast %cst_12 : f32 to vector<8x128xf32>
      %14 = arith.mulf %12, %13 : vector<8x128xf32>
      %c0_13 = arith.constant 0 : index
      %c0_14 = arith.constant 0 : index
      %15 = vector.load %arg5[%c0_13, %c0_14] : memref<1x128xf32, #tpu.memory_space<vmem>>, vector<1x128xf32>
      %16 = vector.broadcast %15 : vector<1x128xf32> to vector<8x128xf32>
      %17 = arith.addf %14, %16 : vector<8x128xf32>
      %c0_15 = arith.constant 0 : index
      %c0_16 = arith.constant 0 : index
      %18 = vector.load %arg6[%c0_15, %c0_16] : memref<8x128xf32, #tpu.memory_space<vmem>>, vector<8x128xf32>
      tpu.vector_store %arg6[%c0_15, %c0_16], %17 {strides = array<i32>} : memref<8x128xf32, #tpu.memory_space<vmem>>, vector<8x128xf32>,
    } else {
    }
    return
  }
  func.func @transform_0(%arg0: i32, %arg1: i32, %arg2: i32) -> (i32, i32) {
    %c0_i32 = arith.constant 0 : i32
    return %arg0, %arg2 : i32, i32
  }
  func.func @transform_1(%arg0: i32, %arg1: i32, %arg2: i32) -> (i32, i32) {
    %c0_i32 = arith.constant 0 : i32
    return %arg1, %arg2 : i32, i32
  }
  func.func @transform_2(%arg0: i32, %arg1: i32, %arg2: i32) -> (i32, i32) {
    %c0_i32 = arith.constant 0 : i32
    %c0_i32_0 = arith.constant 0 : i32
    return %c0_i32, %arg1 : i32, i32
  }
  func.func @transform_3(%arg0: i32, %arg1: i32, %arg2: i32) -> (i32, i32) {
    %c0_i32 = arith.constant 0 : i32
    return %arg0, %arg1 : i32, i32
  }
}

</mosaic_0001>

<bundles_post_ra>
// kernel: tpu_custom_call.1
= control target key start
LH: loop header
LB: loop body
LE: loop exit
PB: predicated region body
PF: predicated region fallthrough
CT: control target
= control target key end

     0   :  { %8 = vsyncpa [#allocation4], 0  ;;  %s240_s0 = inlined_call_operand.hbm [shape: f32[8,128], index: 0, kind: input, shape index: {}]   ;;  %s241_s1 = inlined_call_operand.hbm [shape: f32[128,128], index: 1, kind: input, shape index: {}]   ;;  %s242_s2 = inlined_call_operand.vmem [shape: f32[1,128], index: 2, kind: input, shape index: {}]   ;;  %s243_s3 = inlined_call_operand.hbm [shape: f32[8,128], index: 3, kind: output, shape index: {}]  }
   0x1   :  { %9 = vsyncpa [#allocation7], 0 }
   0x2   :  { %10 = vsyncpa [#allocation5], 0  ;;  %s16_s14 = sshll.u32 %s240_s0, 4  ;;  %s203_s15 = smov [#allocation3]   ;;  %s17_s14 = int_to_ptr.hbm [resolvable:$true] %s16_s14 }
   0x3   :  { %s18_s16 = sshll.u32 %s203_s15, 4  ;;  %s26_s19 = sshll.u32 %s241_s1, 4  ;;  %s19_s16 = int_to_ptr.vmem [resolvable:$true] %s18_s16  ;;  %s27_s19 = int_to_ptr.hbm [resolvable:$true] %s26_s19 }
   0x4   :  { %21 = dma.hbm_to_vmem [thread:$0]  %s17_s14, 128, %s19_s16, [#allocation4]  }
   0x5   :  { %s204_s20 = smov [#allocation6]   ;;  %s205_s22 = smov 128  }
   0x6   :  { %s28_s21 = sshll.u32 %s204_s20, 4  ;;  %s206_s23 = smov 8   ;;  %s29_s21 = int_to_ptr.vmem [resolvable:$true] %s28_s21 }
   0x7   :  { %34 = dma.hbm_to_vmem [thread:$0]  %s27_s19, 2048, %s29_s21, [#allocation7], %s205_s22, %s205_s22, %s206_s23  }
   0x8   :  { %197 = dma.done.wait [#allocation4], 128  }
   0x9   :  { %198 = vsyncadd [#allocation4], 4294967168 }
   0xa   :  { %199 = dma.done.wait [#allocation7], 2048  }
   0xb   :  { %200 = vsyncadd [#allocation7], 4294965248  ;;  %v67_v0 = vld [vmem:[#allocation6 + $0x78] sm:$0xff]  ;;  %v66_v1 = vld [vmem:[#allocation6 + $0x70] sm:$0xff]  ;;  %s207_s24 = smov [#allocation8]   ;;  %s108_s28 = sshll.u32 %s243_s3, 4  ;;  %s109_s28 = int_to_ptr.hbm [resolvable:$true] %s108_s28 }
   0xc   :  { %68 = vmatpush.xpose.msra.mxu0 %v67_v0  ;;  %v65_v2 = vld [vmem:[#allocation6 + $0x68] sm:$0xff]  ;;  %v64_v3 = vld [vmem:[#allocation6 + $0x60] sm:$0xff]  ;;  %v63_v4 = vld [vmem:[#allocation6 + $0x58] sm:$0xff]  ;;  %s106_s25 = sshll.u32 %s207_s24, 4  ;;  %s107_s25 = int_to_ptr.vmem [resolvable:$true] %s106_s25 }
   0xd   :  { %v62_v5 = vld [vmem:[#allocation6 + $0x50] sm:$0xff]  ;;  %v61_v6 = vld [vmem:[#allocation6 + $0x48] sm:$0xff]  ;;  %v60_v7 = vld [vmem:[#allocation6 + $0x40] sm:$0xff] }
   0xe   :  { %v59_v8 = vld [vmem:[#allocation6 + $0x38] sm:$0xff]  ;;  %v58_v9 = vld [vmem:[#allocation6 + $0x30] sm:$0xff]  ;;  %v57_v10 = vld [vmem:[#allocation6 + $0x28] sm:$0xff] }
   0xf   :  { %v56_v11 = vld [vmem:[#allocation6 + $0x20] sm:$0xff]  ;;  %v55_v12 = vld [vmem:[#allocation6 + $0x18] sm:$0xff]  ;;  %v54_v13 = vld [vmem:[#allocation6 + $0x10] sm:$0xff] }
  0x10   :  { %69 = vmatpush.xpose.msra.mxu0 %v66_v1  ;;  %v53_v14 = vld [vmem:[#allocation6 + $0x8] sm:$0xff]  ;;  %v52_v15 = vld [vmem:[#allocation6] sm:$0xff]  ;;  %v51_v16 = vld [vmem:[#allocation3] sm:$0xff] }
  0x11   :  { %v124_v17 = vld [vmem:[%s242_s2] ss:$0 sm:$0xff] }
  0x14   :  { %70 = vmatpush.xpose.msra.mxu0 %v65_v2 }
  0x18   :  { %71 = vmatpush.xpose.msra.mxu0 %v64_v3 }
  0x1c   :  { %72 = vmatpush.xpose.msra.mxu0 %v63_v4 }
  0x20   :  { %73 = vmatpush.xpose.msra.mxu0 %v62_v5 }
  0x24   :  { %74 = vmatpush.xpose.msra.mxu0 %v61_v6 }
  0x28   :  { %75 = vmatpush.xpose.msra.mxu0 %v60_v7 }
  0x2c   :  { %76 = vmatpush.xpose.msra.mxu0 %v59_v8 }
  0x30   :  { %77 = vmatpush.xpose.msra.mxu0 %v58_v9 }
  0x34   :  { %78 = vmatpush.xpose.msra.mxu0 %v57_v10 }
  0x38   :  { %79 = vmatpush.xpose.msra.mxu0 %v56_v11 }
  0x3c   :  { %80 = vmatpush.xpose.msra.mxu0 %v55_v12 }
  0x40   :  { %81 = vmatpush.xpose.msra.mxu0 %v54_v13 }
  0x44   :  { %82 = vmatpush.xpose.msra.mxu0 %v53_v14 }
  0x48   :  { %83 = vmatpush.xpose.msra.mxu0 %v52_v15 }
  0x4b   :  { %84 = vmatmul.f32.vlgmr.msra.gmra.mxu0 %v51_v16 }
  0xc8   :  { %v85_v18 = vpop.f32.mrf.mxu0 }
  0xc9   :  { %v94_v19 = vmul.f32 0.25, %v85_v18 }
  0xcb   :  { %v99_v20 = vadd.f32 %v124_v17, %v94_v19 }
  0xcd   :  { %100 = vst [vmem:[#allocation8] sm:$0xff] %v99_v20 }
  0xce   :  { %111 = dma.vmem_to_hbm [thread:$0]  %s107_s25, 128, %s109_s28, [#allocation5]  }
  0xcf   :  { %201 = dma.done.wait [#allocation5], 128  }
  0xd0   :  { %202 = vsyncadd [#allocation5], 4294967168 }
  0xd1   :  { %116 = vsyncpa [#allocation4], 1 }
  0xd2   :  { %117 = vsyncpa [#allocation7], 1 }
  0xd3   :  { %118 = vsyncpa [#allocation5], 1 }

</bundles_post_ra>
